<compile_context>
chip_gen: v6e
topology: v6e:2x2x1
jax: 0.10.0
libtpu: 0.0.40
codegen_flags: <defaults>
</compile_context>

<pallas_src>
import functools
import math

import jax
import jax.numpy as jnp
from jax.experimental import pallas as pl
from jax.experimental.pallas import tpu as pltpu

LN_EPS = 1e-5
NEG_INF = -1e30


# ----------------------------------------------------------------------------- embedding kernel
def embed_kernel(x_ref, w_ref, b_ref, pos_ref, out_ref, *, batch):
    # (T, F) @ (F, H) + bias + positional encoding broadcast over batch -> (T, H)
    e = jnp.dot(x_ref[...], w_ref[...], preferred_element_type=jnp.float32) + b_ref[...]
    pos = pos_ref[...]                                               # (S, H)
    S, H = pos.shape
    pos_t = jnp.broadcast_to(pos[None, :, :], (batch, S, H)).reshape(batch * S, H)
    out_ref[...] = e + pos_t


# ----------------------------------------------------------------------------- fused layer stack
def layer_stack_kernel(act0_ref, bid_row_ref, bid_col_ref,
                       wqkv_ref, bqkv_ref, wo_ref, bo_ref,
                       ln1g_ref, ln1b_ref,
                       w1_ref, b1_ref, w2_ref, b2_ref,
                       ln2g_ref, ln2b_ref,
                       fc_w_ref, fc_b_ref,
                       out_ref, act_ref, *, num_heads, batch, seq):
    l = pl.program_id(0)
    T, H = act_ref.shape
    hd = H // num_heads

    # ---- load post-embedding activation once (first grid step) ----------------------
    @pl.when(l == 0)
    def _init():
        act_ref[...] = act0_ref[...]

    act = act_ref[...]                                               # (T, H) f32

    # ---- fused QKV projection (softmax scale pre-folded into q weights) -------------
    qkv = (jnp.dot(act.astype(jnp.bfloat16), wqkv_ref[...],
                   preferred_element_type=jnp.float32) + bqkv_ref[...])   # (T, 3H) f32
    q = qkv[:, 0:H]
    k = qkv[:, H:2 * H]
    v = qkv[:, 2 * H:3 * H]

    # ---- block-diagonal batch mask built in-kernel (keeps batch rows independent) ----
    same_batch = bid_row_ref[...] == bid_col_ref[...]                # (T, T) bool

    # ---- per-head attention (lane slices of fused qkv; softmax in f32) ---------------
    dn_qkt = (((1,), (1,)), ((), ()))                                # contract last dims: q @ k^T
    ctx_heads = []
    for h in range(num_heads):
        qh = q[:, h * hd:(h + 1) * hd]
        kh = k[:, h * hd:(h + 1) * hd]
        vh = v[:, h * hd:(h + 1) * hd]
        s = jax.lax.dot_general(qh, kh, dn_qkt,
                                preferred_element_type=jnp.float32)  # (T, T)
        s = jnp.where(same_batch, s, NEG_INF)
        s = s - jnp.max(s, axis=-1, keepdims=True)
        p = jnp.exp(s)
        p = p * pl.reciprocal(jnp.sum(p, axis=-1, keepdims=True), approx=True)
        ctx_heads.append(jnp.dot(p, vh, preferred_element_type=jnp.float32))
    ctx = jnp.concatenate(ctx_heads, axis=-1)                        # (T, H)

    # ---- single full-width output projection -----------------------------------------
    attn_out = (jnp.dot(ctx.astype(jnp.bfloat16), wo_ref[...],
                        preferred_element_type=jnp.float32) + bo_ref[...])

    # ---- residual + LayerNorm1 (f32 stats) --------------------------------------------
    y = act + attn_out
    mu = jnp.mean(y, axis=-1, keepdims=True)
    var = jnp.mean((y - mu) ** 2, axis=-1, keepdims=True)
    y = (y - mu) * jax.lax.rsqrt(var + LN_EPS) * ln1g_ref[...] + ln1b_ref[...]

    # ---- feed forward (bf16 weights, f32 accumulate), dropout = identity --------------
    h1 = (jnp.dot(y.astype(jnp.bfloat16), w1_ref[...],
                  preferred_element_type=jnp.float32) + b1_ref[...])
    h1 = jnp.maximum(h1, 0.0)
    h2 = (jnp.dot(h1.astype(jnp.bfloat16), w2_ref[...],
                  preferred_element_type=jnp.float32) + b2_ref[...])

    # ---- residual + LayerNorm2 ----------------------------------------------------------
    z = y + h2
    mu2 = jnp.mean(z, axis=-1, keepdims=True)
    var2 = jnp.mean((z - mu2) ** 2, axis=-1, keepdims=True)
    z = (z - mu2) * jax.lax.rsqrt(var2 + LN_EPS) * ln2g_ref[...] + ln2b_ref[...]

    act_ref[...] = z

    # ---- last-token select (strided read) + fc head (last grid step only) --------------
    @pl.when(l == pl.num_programs(0) - 1)
    def _head():
        x_last = act_ref[pl.ds(seq - 1, batch, stride=seq), :]       # (B, H)
        out_ref[...] = (jnp.dot(x_last, fc_w_ref[...],
                                preferred_element_type=jnp.float32) + fc_b_ref[...])


# ----------------------------------------------------------------------------- wrapper
def transformer_predictor_forward(x, params, *, num_heads):
    # x: (B, S, input_dim)  ->  (B, 1)
    B, S, F = x.shape
    H = params["emb_w"].shape[0]
    layers = params["layers"]
    NL = len(layers)
    FFN = layers[0]["lin1_w"].shape[0]
    hd = H // num_heads
    T = B * S
    scale = 1.0 / math.sqrt(float(hd))

    # ---- embedding + positional encoding in its own tiny kernel -----------------------
    x2d = x.reshape(T, F)
    emb_w_t = params["emb_w"].T                                      # (F, H)
    emb_b = params["emb_b"]                                          # (1, H)
    pos = params["pos"]                                              # (S, H)
    act0 = pl.pallas_call(
        functools.partial(embed_kernel, batch=B),
        out_shape=jax.ShapeDtypeStruct((T, H), jnp.float32),
    )(x2d, emb_w_t, emb_b, pos)

    # ---- host-side one-time layout prep (no in-kernel transposes of constants) --------
    def prep_layer(p):
        in_w = p["in_w"]                                             # (3H, H)
        in_b = p["in_b"][0]                                          # (3H,)
        wqkv = jnp.concatenate(
            [in_w[0:H].T * scale, in_w[H:2 * H].T, in_w[2 * H:3 * H].T],
            axis=1).astype(jnp.bfloat16)                             # (H, 3H)
        bqkv = jnp.concatenate(
            [in_b[0:H] * scale, in_b[H:2 * H], in_b[2 * H:3 * H]]).reshape(1, 3 * H)
        wo = p["out_w"].T.astype(jnp.bfloat16)                       # (H, H)
        w1 = p["lin1_w"].T.astype(jnp.bfloat16)                      # (H, FFN)
        w2 = p["lin2_w"].T.astype(jnp.bfloat16)                      # (FFN, H)
        return (wqkv, bqkv, wo, p["out_b"], p["ln1_g"], p["ln1_b"],
                w1, p["lin1_b"], w2, p["lin2_b"], p["ln2_g"], p["ln2_b"])

    stacked = [jnp.stack(arrs, axis=0)
               for arrs in zip(*(prep_layer(p) for p in layers))]
    (wqkv_s, bqkv_s, wo_s, bo_s, ln1g_s, ln1b_s,
     w1_s, b1_s, w2_s, b2_s, ln2g_s, ln2b_s) = stacked

    fc_w_t = params["fc_w"].T                                        # (H, 1)
    fc_b = params["fc_b"]                                            # (1, 1)

    batch_ids = jnp.arange(T, dtype=jnp.int32) // S
    bid_row = batch_ids.reshape(T, 1)
    bid_col = batch_ids.reshape(1, T)

    kernel = functools.partial(layer_stack_kernel,
                               num_heads=num_heads, batch=B, seq=S)

    def const_spec(shape):
        n = len(shape)
        return pl.BlockSpec(shape, lambda l: (0,) * n)

    def layer_spec(shape):
        n = len(shape)
        return pl.BlockSpec((None,) + shape, lambda l: (l,) + (0,) * n)

    flops = int(NL * (2 * T * H * 3 * H          # fused qkv projection
                      + 4 * T * T * H            # scores + attn*V (all heads)
                      + 2 * T * H * H            # output projection
                      + 4 * T * H * FFN)         # FFN
                + 2 * B * H)
    all_inputs = [act0, bid_row, bid_col] + list(stacked) + [fc_w_t, fc_b]
    bytes_accessed = int(sum(int(a.size) * a.dtype.itemsize for a in all_inputs) + B * 4)
    cost = pl.CostEstimate(flops=flops,
                           transcendentals=int(NL * num_heads * T * T),
                           bytes_accessed=bytes_accessed)

    return pl.pallas_call(
        kernel,
        out_shape=jax.ShapeDtypeStruct((B, 1), jnp.float32),
        grid=(NL,),
        in_specs=[
            const_spec((T, H)),                 # act0 (post-embedding activation)
            const_spec((T, 1)),                 # batch ids (rows)
            const_spec((1, T)),                 # batch ids (cols)
            layer_spec((H, 3 * H)),             # fused qkv weight (bf16, scale folded)
            layer_spec((1, 3 * H)),             # fused qkv bias
            layer_spec((H, H)),                 # out-proj weight (bf16)
            layer_spec((1, H)),                 # out-proj bias
            layer_spec((1, H)),                 # ln1 gamma
            layer_spec((1, H)),                 # ln1 beta
            layer_spec((H, FFN)),               # linear1 weight (bf16)
            layer_spec((1, FFN)),               # linear1 bias
            layer_spec((FFN, H)),               # linear2 weight (bf16)
            layer_spec((1, H)),                 # linear2 bias
            layer_spec((1, H)),                 # ln2 gamma
            layer_spec((1, H)),                 # ln2 beta
            const_spec((H, 1)),                 # fc weight
            const_spec((1, 1)),                 # fc bias
        ],
        out_specs=pl.BlockSpec((B, 1), lambda l: (0, 0)),
        scratch_shapes=[pltpu.VMEM((T, H), jnp.float32)],
        compiler_params=pltpu.CompilerParams(dimension_semantics=("arbitrary",)),
        cost_estimate=cost,
    )(act0, bid_row, bid_col,
      wqkv_s, bqkv_s, wo_s, bo_s, ln1g_s, ln1b_s,
      w1_s, b1_s, w2_s, b2_s, ln2g_s, ln2b_s,
      fc_w_t, fc_b)


# ----------------------------------------------------------------------------- params
def init_params(key, input_dim, seq_length, num_heads, num_layers, hidden_dim, ffn_dim):
    def dense(k, out_d, in_d):
        kw, kb = jax.random.split(k)
        w = jax.random.normal(kw, (out_d, in_d), jnp.float32) * 0.02
        b = jax.random.normal(kb, (1, out_d), jnp.float32) * 0.02
        return w, b

    keys = jax.random.split(key, 2 + num_layers)
    emb_w, emb_b = dense(keys[0], hidden_dim, input_dim)
    fc_w, fc_b = dense(keys[1], 1, hidden_dim)
    fc_b = fc_b.reshape(1, 1)
    pos = jnp.zeros((seq_length, hidden_dim), jnp.float32)   # nn.Parameter(torch.zeros(...))

    layers = []
    for l in range(num_layers):
        lk = jax.random.split(keys[2 + l], 4)
        in_w, in_b = dense(lk[0], 3 * hidden_dim, hidden_dim)
        out_w, out_b = dense(lk[1], hidden_dim, hidden_dim)
        w1, b1 = dense(lk[2], ffn_dim, hidden_dim)
        w2, b2 = dense(lk[3], hidden_dim, ffn_dim)
        layers.append(dict(
            in_w=in_w, in_b=in_b, out_w=out_w, out_b=out_b,
            ln1_g=jnp.ones((1, hidden_dim), jnp.float32),
            ln1_b=jnp.zeros((1, hidden_dim), jnp.float32),
            lin1_w=w1, lin1_b=b1, lin2_w=w2, lin2_b=b2,
            ln2_g=jnp.ones((1, hidden_dim), jnp.float32),
            ln2_b=jnp.zeros((1, hidden_dim), jnp.float32),
        ))
    return dict(emb_w=emb_w, emb_b=emb_b, pos=pos, layers=layers, fc_w=fc_w, fc_b=fc_b)


# ----------------------------------------------------------------------------- main
if __name__ == "__main__":
    B = 2            # batch
    S = 8            # seq_length
    F = 4            # input_dim
    H = 32           # hidden_dim
    NH = 4           # num_heads
    NL = 2           # num_layers
    FFN = 2048       # nn.TransformerEncoderLayer default dim_feedforward

    key = jax.random.PRNGKey(0)
    kx, kp = jax.random.split(key)
    x = jax.random.normal(kx, (B, S, F), jnp.float32)
    params = init_params(kp, F, S, NH, NL, H, FFN)

    out = transformer_predictor_forward(x, params, num_heads=NH)
    out = jax.block_until_ready(out)
    assert out.shape == (B, 1) and out.dtype == jnp.float32
    print("KERNEL_OK")
</pallas_src>

<mosaic_0001>
module attributes {stable_mosaic.version = 11 : i64} {
  func.func @embed_kernel(%arg0: memref<16x4xf32, #tpu.memory_space<vmem>>, %arg1: memref<4x32xf32, #tpu.memory_space<vmem>>, %arg2: memref<1x32xf32, #tpu.memory_space<vmem>>, %arg3: memref<8x32xf32, #tpu.memory_space<vmem>>, %arg4: memref<16x32xf32, #tpu.memory_space<vmem>>) attributes {dimension_semantics = [], scalar_prefetch = 0 : i64, scratch_operands = 0 : i64, tpu.core_type = #tpu.core_type<tc>} {
    %c0 = arith.constant 0 : index
    %c0_0 = arith.constant 0 : index
    %0 = vector.load %arg0[%c0, %c0_0] : memref<16x4xf32, #tpu.memory_space<vmem>>, vector<16x4xf32>
    %c0_1 = arith.constant 0 : index
    %c0_2 = arith.constant 0 : index
    %1 = vector.load %arg1[%c0_1, %c0_2] : memref<4x32xf32, #tpu.memory_space<vmem>>, vector<4x32xf32>
    %cst = arith.constant dense<0.000000e+00> : vector<16x32xf32>
    %2 = tpu.matmul %0, %1, %cst {dimension_numbers = #tpu.dot_dimension_numbers<[1], [0], [0], [1], [0, 0, 1, 1], [], []>} : vector<16x4xf32>, vector<4x32xf32>, vector<16x32xf32> -> vector<16x32xf32>
    %c0_3 = arith.constant 0 : index
    %c0_4 = arith.constant 0 : index
    %3 = vector.load %arg2[%c0_3, %c0_4] : memref<1x32xf32, #tpu.memory_space<vmem>>, vector<1x32xf32>
    %4 = vector.broadcast %3 : vector<1x32xf32> to vector<16x32xf32>
    %5 = arith.addf %2, %4 : vector<16x32xf32>
    %c0_5 = arith.constant 0 : index
    %c0_6 = arith.constant 0 : index
    %6 = vector.load %arg3[%c0_5, %c0_6] : memref<8x32xf32, #tpu.memory_space<vmem>>, vector<8x32xf32>
    %7 = vector.shape_cast %6 : vector<8x32xf32> to vector<1x8x32xf32>
    %8 = vector.shape_cast %7 : vector<1x8x32xf32> to vector<1x8x32xf32>
    %9 = vector.broadcast %8 : vector<1x8x32xf32> to vector<2x8x32xf32>
    %10 = vector.shape_cast %9 : vector<2x8x32xf32> to vector<16x32xf32>
    %11 = arith.addf %5, %10 : vector<16x32xf32>
    %c0_7 = arith.constant 0 : index
    %c0_8 = arith.constant 0 : index
    %12 = vector.load %arg4[%c0_7, %c0_8] : memref<16x32xf32, #tpu.memory_space<vmem>>, vector<16x32xf32>
    tpu.vector_store %arg4[%c0_7, %c0_8], %11 {strides = array<i32>} : memref<16x32xf32, #tpu.memory_space<vmem>>, vector<16x32xf32>,
    return
  }
}

</mosaic_0001>

<bundles_post_ra>
// kernel: tpu_custom_call.1
= control target key start
LH: loop header
LB: loop body
LE: loop exit
PB: predicated region body
PF: predicated region fallthrough
CT: control target
= control target key end

     0   :  { %vm35_vm0 = vcmask 1043456   ;;  %vm28_vm1 = vcmask 31744   ;;  %s219_s0 = inlined_call_operand.vmem [shape: f32[16,4], index: 0, kind: input, shape index: {}]   ;;  %s220_s1 = inlined_call_operand.vmem [shape: f32[4,32], index: 1, kind: input, shape index: {}]   ;;  %s221_s2 = inlined_call_operand.vmem [shape: f32[1,32], index: 2, kind: input, shape index: {}]   ;;  %s222_s3 = inlined_call_operand.vmem [shape: f32[8,32], index: 3, kind: input, shape index: {}]   ;;  %s223_s4 = inlined_call_operand.hbm [shape: f32[16,32], index: 4, kind: output, shape index: {}]  }
   0x1   :  { %v20_v0 = vld [vmem:[%s220_s1] sm:$0xf]  ;;  %v19_v2 = vld [vmem:[%s219_s0 + $0x8] sm:$0xff] }
   0x2   :  { %v18_v1 = vld [vmem:[%s219_s0] sm:$0xff]  ;;  %143 = vmatprep.subr.msk.mxu0 %vm35_vm0, %v20_v0 }
   0x3   :  { %145 = vmatprep.mubr.msk.f32.mxu0 %vm28_vm1, %v18_v1 }
   0x4   :  { %9 = vsyncpa [#allocation3], 0  ;;  %144 = vmatpush3.msk.msra.mxu0 %vm35_vm0, %v20_v0  ;;  %v136_v3 = vld [vmem:[%s221_s2] ss:$0 sm:$0xff]  ;;  %s173_s24 = smov [#allocation2]   ;;  %vm117_vm2 = vcmask 261120  }
   0x5   :  { %146 = vmatmul.mubr.msk.f32.vlgmr.msra.gmra.mxu0 %vm28_vm1, %v19_v2  ;;  %v114_v5 = vld [vmem:[%s222_s3] sm:$0xff]  ;;  %s125_s25 = sshll.u32 %s173_s24, 4  ;;  %s126_s25 = int_to_ptr.vmem [resolvable:$true] %s125_s25 }
   0x6   :  { %s151_s0 = scalar_lea.vmem %s126_s25, 256  ;;  %p156_p1 = scmp.lt.s32.totalorder %s126_s25, %s126_s25 }
   0x7   :  { %p152_p0 = scmp.ne.s32.totalorder %s126_s25, %s151_s0  ;;  %p157_p2 = scmp.lt.s32.totalorder %s151_s0, %s151_s0 }
   0x9   :  { %p158_p3 = por %p157_p2, %p156_p1 }
   0xb   :  { %p159_p4 = pnand %p158_p3, %p152_p0 }
  0xc5   :  { %v147_v4 = vpop.f32.mrf.mxu0 }
  0xc6   :  { %v111_v6 = vadd.f32 %v147_v4, %v136_v3 }
  0xc7   :  { %v105_v7 = vpop.f32.mrf.mxu0 }
  0xc8   :  { %v116_v8 = vadd.f32 %v114_v5, %v111_v6  ;;  %v106_v9 = vadd.f32 %v136_v3, %v105_v7 }
  0xca   :  { %119 = vst.msk [vmem:[#allocation2 + $0x8] sm:$0xff] %vm117_vm2, %v116_v8  ;;  %v115_v10 = vadd.f32 %v114_v5, %v106_v9 }
  0xcc   :  { %118 = vst.msk [vmem:[#allocation2] sm:$0xff] %vm117_vm2, %v115_v10 }
  0xcd   :  { %162 = shalt.err (!%p159_p4)
}
  0xce   :  { %s174_s2 = smov 128   ;;  %s175_s3 = smov 8  }
  0xcf   :  { %131 = dma.vmem_to_hbm [thread:$0]  %s126_s25, 256, %s223_s4, [#allocation3], %s174_s2, %s174_s2, %s175_s3  }
  0xd0   :  { %171 = dma.done.wait [#allocation3], 256  }
  0xd1   :  { %172 = vsyncadd [#allocation3], 4294967040 }
  0xd2   :  { %135 = vsyncpa [#allocation3], 1 }

</bundles_post_ra>
